<compile_context>
chip_gen: v6e
topology: v6e:2x2x1
jax: 0.10.0
libtpu: 0.0.40
codegen_flags: <defaults>
</compile_context>

<pallas_src>
from functools import partial

import jax
import jax.numpy as jnp
from jax.experimental import pallas as pl
from jax.experimental.pallas import tpu as pltpu


def _fused_conv_stack_kernel(x_ref, *refs, B, L, layer_dims, kernel_sizes,
                             residual, log_softmax, mxu_dtype):
    """refs = (w0, b0, w1, b1, ..., w_{n-1}, b_{n-1}, o_ref).

    x_ref : (1, B*L)        lane-dense logits row (batch folded into lanes)
    w_i   : (Cout_i, K_i*Cin_i)  weights, column index = k*Cin + cin
    b_i   : (Cout_i, 1)
    o_ref : (1, B*L)        lane-dense output row
    """
    n_layers = len(kernel_sizes)
    w_refs = [refs[2 * i] for i in range(n_layers)]
    b_refs = [refs[2 * i + 1] for i in range(n_layers)]
    o_ref = refs[2 * n_layers]

    N = B * L
    # Batch-segment boundary masks from a single lane iota (no O(B) unroll).
    col = jax.lax.broadcasted_iota(jnp.int32, (1, N), 1)      # (1, N)
    pos = col % L                                             # position in segment
    is_first = pos == 0                                       # segment starts
    is_last = pos == (L - 1)                                  # segment ends

    x = x_ref[...].astype(jnp.float32)                        # (1, N)

    if log_softmax:
        # Vectorized segmented log_softmax over each length-L batch segment:
        # one lane-reduce per statistic + a sublane scatter-back, all on the
        # lane-dense row (no per-b Python loop, no reshapes/slices).
        seg_id = col // L                                               # (1, N)
        batch_id = jax.lax.broadcasted_iota(jnp.int32, (B, 1), 0)       # (B, 1)
        seg = seg_id == batch_id                                        # (B, N)
        neg_inf = jnp.float32(-jnp.inf)
        mx_b = jnp.max(jnp.where(seg, x, neg_inf), axis=1, keepdims=True)   # (B, 1)
        mx_n = jnp.sum(jnp.where(seg, mx_b, 0.0), axis=0, keepdims=True)    # (1, N)
        s_b = jnp.sum(jnp.where(seg, jnp.exp(x - mx_n), 0.0),
                      axis=1, keepdims=True)                                # (B, 1)
        lse_b = jnp.log(s_b) + mx_b                                         # (B, 1)
        lse_n = jnp.sum(jnp.where(seg, lse_b, 0.0), axis=0, keepdims=True)  # (1, N)
        x = x - lse_n

    def shift_back(v):
        # v[:, n] -> value at previous position, clamped at segment start.
        rolled = pltpu.roll(v, shift=1, axis=1)               # rolled[:, n] = v[:, n-1]
        return jnp.where(is_first, v, rolled)

    def shift_fwd(v):
        # v[:, n] -> value at next position, clamped at segment end.
        rolled = pltpu.roll(v, shift=N - 1, axis=1)           # rolled[:, n] = v[:, n+1]
        return jnp.where(is_last, v, rolled)

    h = x                                                     # (Cin, N)
    for li in range(n_layers):
        K = kernel_sizes[li]
        p = K // 2
        Cin, Cout = layer_dims[li]
        W = w_refs[li][...].astype(jnp.float32)               # (Cout, K*Cin)
        bias = b_refs[li][...].astype(jnp.float32)            # (Cout, 1)

        # shifted[k][:, n] == h[:, clamp_within_segment(n + k - p)]  (replicate pad)
        shifted = [None] * K
        shifted[p] = h
        for d in range(1, p + 1):
            shifted[p - d] = shift_back(shifted[p - d + 1])
            shifted[p + d] = shift_fwd(shifted[p + d - 1])

        if Cin == 1:
            # Length-1 channel contraction: f32 VPU broadcast-MACs, skip the MXU.
            acc = jnp.broadcast_to(bias, (Cout, N))
            for k in range(K):
                acc = acc + W[:, k:k + 1] * shifted[k]
        else:
            # Single fused MXU matmul per layer: taps stacked on the
            # contraction (sublane) dim; bf16 operands, f32 accumulate.
            stacked = jnp.concatenate(shifted, axis=0)        # (K*Cin, N)
            acc = jnp.dot(W.astype(mxu_dtype), stacked.astype(mxu_dtype),
                          preferred_element_type=jnp.float32) + bias
        if li < n_layers - 1:
            acc = jnp.maximum(acc, 0.0)                       # fused ReLU (f32 VPU)
        h = acc

    if residual:
        h = h + x
    o_ref[...] = h.astype(o_ref.dtype)                        # one unmasked lane-dense store


def conv_model_forward(logits, params, *, residual=False, log_softmax=False,
                       mxu_dtype=jnp.bfloat16):
    """Equivalent of ConvModel.forward. logits: (B, L). Returns (B, L)."""
    B, L = logits.shape
    N = B * L
    kernel_sizes = []
    layer_dims = []
    inputs = [logits.reshape(1, N)]                           # lane-dense logits row
    for (w, b) in params:
        Cout, Cin, K = w.shape
        # TODO(synk): even kernel sizes change the sequence length layer-to-layer
        # (PyTorch allows it); this fused kernel supports same-length (odd-K) convs.
        assert K % 2 == 1, "fused Pallas kernel supports odd kernel sizes only"
        kernel_sizes.append(K)
        layer_dims.append((Cin, Cout))
        # Weight layout (Cout, K*Cin): column index = k*Cin + cin, matching the
        # in-kernel tap stack along the contraction (sublane) dim.
        inputs.append(jnp.transpose(w, (0, 2, 1)).reshape(Cout, K * Cin))
        inputs.append(b.reshape(Cout, 1))

    kernel = partial(
        _fused_conv_stack_kernel, B=B, L=L,
        layer_dims=tuple(layer_dims), kernel_sizes=tuple(kernel_sizes),
        residual=residual, log_softmax=log_softmax, mxu_dtype=mxu_dtype)

    out_row = pl.pallas_call(
        kernel,
        out_shape=jax.ShapeDtypeStruct((1, N), logits.dtype),
        in_specs=[pl.BlockSpec(memory_space=pltpu.MemorySpace.VMEM)
                  for _ in inputs],
        out_specs=pl.BlockSpec(memory_space=pltpu.MemorySpace.VMEM),
        compiler_params=pltpu.CompilerParams(
            vmem_limit_bytes=64 * 1024 * 1024),
    )(*inputs)
    return out_row.reshape(B, L)


def init_params(key, num_hiddens, kernel_sizes):
    """Deterministic parameter init matching torch.nn.Conv1d default shapes/init."""
    params = []
    in_ch = 1
    out_channels = list(num_hiddens) + [1]
    for out_ch, K in zip(out_channels, kernel_sizes):
        key, kw, kb = jax.random.split(key, 3)
        bound = 1.0 / (in_ch * K) ** 0.5
        w = jax.random.uniform(kw, (out_ch, in_ch, K), jnp.float32, -bound, bound)
        b = jax.random.uniform(kb, (out_ch,), jnp.float32, -bound, bound)
        params.append((w, b))
        in_ch = out_ch
    return params


def ref_forward(logits, params, *, residual=False, log_softmax=False):
    """Pure-JAX reference mirroring the PyTorch NCL semantics."""
    x = logits
    if log_softmax:
        x = jax.nn.log_softmax(x, axis=1)
    h = x[:, None, :]                                         # (B, 1, L)
    n = len(params)
    for i, (w, b) in enumerate(params):
        K = w.shape[2]
        p = K // 2
        hp = jnp.pad(h, ((0, 0), (0, 0), (p, p)), mode="edge")
        h = jax.lax.conv_general_dilated(
            hp, w, window_strides=(1,), padding="VALID",
            dimension_numbers=("NCH", "OIH", "NCH")) + b[None, :, None]
        if i < n - 1:
            h = jax.nn.relu(h)
    if residual:
        h = h + x[:, None, :]
    return h[:, 0, :]


if __name__ == "__main__":
    num_hiddens = [8, 16]            # ConvModel(num_hiddens=[8, 16], kernel_size=3)
    kernel_sizes = [3, 3, 3]         # len(num_hiddens) + 1
    B, L = 4, 32                     # batch, sequence (num_classes) length

    key = jax.random.PRNGKey(0)
    key, kx, kp = jax.random.split(key, 3)
    logits = jax.random.normal(kx, (B, L), jnp.float32)
    params = init_params(kp, num_hiddens, kernel_sizes)

    # 1) Default ConvModel config with the performance-default bf16 MXU operands
    #    (f32 accumulate) — tolerance sized for bf16 operand rounding.
    fwd = jax.jit(lambda x: conv_model_forward(x, params,
                                               residual=False, log_softmax=False))
    out = fwd(logits)
    jax.block_until_ready(out)
    ref = ref_forward(logits, params, residual=False, log_softmax=False)
    assert out.shape == (B, L), out.shape
    assert jnp.allclose(out, ref, atol=5e-2, rtol=5e-2), "bf16-MXU mismatch vs reference"

    # 2) Same structure with f32 MXU operands — tight tolerance verifies the
    #    roll/clamp/tap-stack/weight-layout logic exactly.
    fwd_f32 = jax.jit(lambda x: conv_model_forward(x, params, mxu_dtype=jnp.float32))
    out_f32 = fwd_f32(logits)
    jax.block_until_ready(out_f32)
    assert jnp.allclose(out_f32, ref, atol=1e-4, rtol=1e-4), "f32 mismatch vs reference"

    # 3) Residual + log_softmax path (also fused inside the same kernel).
    fwd_rs = jax.jit(lambda x: conv_model_forward(
        x, params, residual=True, log_softmax=True, mxu_dtype=jnp.float32))
    out_rs = fwd_rs(logits)
    jax.block_until_ready(out_rs)
    ref_rs = ref_forward(logits, params, residual=True, log_softmax=True)
    assert jnp.allclose(out_rs, ref_rs, atol=1e-4, rtol=1e-4), \
        "residual/log_softmax mismatch vs reference"

    print("KERNEL_OK")
</pallas_src>

<mosaic_0001>
module attributes {stable_mosaic.version = 11 : i64} {
  func.func @_fused_conv_stack_kernel(%arg0: memref<1x128xf32, #tpu.memory_space<vmem>>, %arg1: memref<8x3xf32, #tpu.memory_space<vmem>>, %arg2: memref<8x1xf32, #tpu.memory_space<vmem>>, %arg3: memref<16x24xf32, #tpu.memory_space<vmem>>, %arg4: memref<16x1xf32, #tpu.memory_space<vmem>>, %arg5: memref<1x48xf32, #tpu.memory_space<vmem>>, %arg6: memref<1x1xf32, #tpu.memory_space<vmem>>, %arg7: memref<1x128xf32, #tpu.memory_space<vmem>>) attributes {dimension_semantics = [], scalar_prefetch = 0 : i64, scratch_operands = 0 : i64, tpu.core_type = #tpu.core_type<tc>} {
    %0 = tpu.iota {dimensions = array<i32: 1>} : vector<1x128xi32>
    %c32_i32 = arith.constant 32 : i32
    %c0_i32 = arith.constant 0 : i32
    %1 = arith.cmpi eq, %c32_i32, %c0_i32 : i32
    %c1_i32 = arith.constant 1 : i32
    %2 = arith.select %1, %c1_i32, %c32_i32 : i32
    %3 = vector.broadcast %2 : i32 to vector<1x128xi32>
    %4 = arith.remsi %0, %3 : vector<1x128xi32>
    %c0_i32_0 = arith.constant 0 : i32
    %5 = vector.broadcast %c0_i32_0 : i32 to vector<1x128xi32>
    %6 = arith.cmpi ne, %4, %5 : vector<1x128xi32>
    %c0_i32_1 = arith.constant 0 : i32
    %7 = vector.broadcast %c0_i32_1 : i32 to vector<1x128xi32>
    %8 = arith.cmpi slt, %4, %7 : vector<1x128xi32>
    %c0_i32_2 = arith.constant 0 : i32
    %9 = arith.cmpi slt, %2, %c0_i32_2 : i32
    %10 = vector.broadcast %9 : i1 to vector<1x128xi1>
    %11 = vector.broadcast %10 : vector<1x128xi1> to vector<1x128xi1>
    %12 = arith.xori %8, %11 : vector<1x128xi1>
    %13 = arith.andi %12, %6 : vector<1x128xi1>
    %14 = vector.broadcast %2 : i32 to vector<1x128xi32>
    %15 = arith.addi %4, %14 : vector<1x128xi32>
    %16 = arith.select %13, %15, %4 : vector<1x128xi1>, vector<1x128xi32>
    %c0_i32_3 = arith.constant 0 : i32
    %17 = vector.broadcast %c0_i32_3 : i32 to vector<1x128xi32>
    %18 = arith.cmpi eq, %16, %17 : vector<1x128xi32>
    %c31_i32 = arith.constant 31 : i32
    %19 = vector.broadcast %c31_i32 : i32 to vector<1x128xi32>
    %20 = arith.cmpi eq, %16, %19 : vector<1x128xi32>
    %c0 = arith.constant 0 : index
    %c0_4 = arith.constant 0 : index
    %21 = vector.load %arg0[%c0, %c0_4] : memref<1x128xf32, #tpu.memory_space<vmem>>, vector<1x128xf32>
    %c0_5 = arith.constant 0 : index
    %c0_6 = arith.constant 0 : index
    %22 = vector.load %arg1[%c0_5, %c0_6] : memref<8x3xf32, #tpu.memory_space<vmem>>, vector<8x3xf32>
    %c0_7 = arith.constant 0 : index
    %c0_8 = arith.constant 0 : index
    %23 = vector.load %arg2[%c0_7, %c0_8] : memref<8x1xf32, #tpu.memory_space<vmem>>, vector<8x1xf32>
    %c1_i32_9 = arith.constant 1 : i32
    %24 = tpu.dynamic_rotate %21 by %c1_i32_9 dim 1 : vector<1x128xf32>, i32 -> vector<1x128xf32>
    %25 = arith.select %18, %21, %24 : vector<1x128xi1>, vector<1x128xf32>
    %c127_i32 = arith.constant 127 : i32
    %26 = tpu.dynamic_rotate %21 by %c127_i32 dim 1 : vector<1x128xf32>, i32 -> vector<1x128xf32>
    %27 = arith.select %20, %21, %26 : vector<1x128xi1>, vector<1x128xf32>
    %28 = vector.shape_cast %23 : vector<8x1xf32> to vector<8x1xf32>
    %29 = vector.broadcast %28 : vector<8x1xf32> to vector<8x128xf32>
    %30 = vector.extract_strided_slice %22 {offsets = [0, 0], sizes = [8, 1], strides = [1, 1]} : vector<8x3xf32> to vector<8x1xf32>
    %31 = vector.broadcast %30 : vector<8x1xf32> to vector<8x128xf32>
    %32 = vector.broadcast %25 : vector<1x128xf32> to vector<8x128xf32>
    %33 = arith.mulf %31, %32 : vector<8x128xf32>
    %34 = arith.addf %29, %33 : vector<8x128xf32>
    %35 = vector.extract_strided_slice %22 {offsets = [0, 1], sizes = [8, 1], strides = [1, 1]} : vector<8x3xf32> to vector<8x1xf32>
    %36 = vector.broadcast %35 : vector<8x1xf32> to vector<8x128xf32>
    %37 = vector.broadcast %21 : vector<1x128xf32> to vector<8x128xf32>
    %38 = arith.mulf %36, %37 : vector<8x128xf32>
    %39 = arith.addf %34, %38 : vector<8x128xf32>
    %40 = vector.extract_strided_slice %22 {offsets = [0, 2], sizes = [8, 1], strides = [1, 1]} : vector<8x3xf32> to vector<8x1xf32>
    %41 = vector.broadcast %40 : vector<8x1xf32> to vector<8x128xf32>
    %42 = vector.broadcast %27 : vector<1x128xf32> to vector<8x128xf32>
    %43 = arith.mulf %41, %42 : vector<8x128xf32>
    %44 = arith.addf %39, %43 : vector<8x128xf32>
    %cst = arith.constant 0.000000e+00 : f32
    %45 = vector.broadcast %cst : f32 to vector<8x128xf32>
    %46 = arith.maximumf %44, %45 : vector<8x128xf32>
    %c0_10 = arith.constant 0 : index
    %c0_11 = arith.constant 0 : index
    %47 = vector.load %arg3[%c0_10, %c0_11] : memref<16x24xf32, #tpu.memory_space<vmem>>, vector<16x24xf32>
    %c0_12 = arith.constant 0 : index
    %c0_13 = arith.constant 0 : index
    %48 = vector.load %arg4[%c0_12, %c0_13] : memref<16x1xf32, #tpu.memory_space<vmem>>, vector<16x1xf32>
    %c1_i32_14 = arith.constant 1 : i32
    %49 = tpu.dynamic_rotate %46 by %c1_i32_14 dim 1 : vector<8x128xf32>, i32 -> vector<8x128xf32>
    %50 = vector.shape_cast %18 : vector<1x128xi1> to vector<1x128xi1>
    %51 = vector.broadcast %50 : vector<1x128xi1> to vector<8x128xi1>
    %52 = arith.select %51, %46, %49 : vector<8x128xi1>, vector<8x128xf32>
    %c127_i32_15 = arith.constant 127 : i32
    %53 = tpu.dynamic_rotate %46 by %c127_i32_15 dim 1 : vector<8x128xf32>, i32 -> vector<8x128xf32>
    %54 = vector.shape_cast %20 : vector<1x128xi1> to vector<1x128xi1>
    %55 = vector.broadcast %54 : vector<1x128xi1> to vector<8x128xi1>
    %56 = arith.select %55, %46, %53 : vector<8x128xi1>, vector<8x128xf32>
    %57 = tpu.concatenate %52, %46, %56 in 0 : vector<8x128xf32>, vector<8x128xf32>, vector<8x128xf32> -> vector<24x128xf32>
    %58 = arith.truncf %47 : vector<16x24xf32> to vector<16x24xbf16>
    %59 = arith.truncf %57 : vector<24x128xf32> to vector<24x128xbf16>
    %cst_16 = arith.constant dense<0.000000e+00> : vector<16x128xf32>
    %60 = tpu.matmul %58, %59, %cst_16 {dimension_numbers = #tpu.dot_dimension_numbers<[1], [0], [0], [1], [0, 0, 1, 1], [], []>} : vector<16x24xbf16>, vector<24x128xbf16>, vector<16x128xf32> -> vector<16x128xf32>
    %61 = vector.broadcast %48 : vector<16x1xf32> to vector<16x128xf32>
    %62 = arith.addf %60, %61 : vector<16x128xf32>
    %cst_17 = arith.constant 0.000000e+00 : f32
    %63 = vector.broadcast %cst_17 : f32 to vector<16x128xf32>
    %64 = arith.maximumf %62, %63 : vector<16x128xf32>
    %c0_18 = arith.constant 0 : index
    %c0_19 = arith.constant 0 : index
    %65 = vector.load %arg5[%c0_18, %c0_19] : memref<1x48xf32, #tpu.memory_space<vmem>>, vector<1x48xf32>
    %c0_20 = arith.constant 0 : index
    %c0_21 = arith.constant 0 : index
    %66 = vector.load %arg6[%c0_20, %c0_21] : memref<1x1xf32, #tpu.memory_space<vmem>>, vector<1x1xf32>
    %c1_i32_22 = arith.constant 1 : i32
    %67 = tpu.dynamic_rotate %64 by %c1_i32_22 dim 1 : vector<16x128xf32>, i32 -> vector<16x128xf32>
    %68 = vector.shape_cast %18 : vector<1x128xi1> to vector<1x128xi1>
    %69 = vector.broadcast %68 : vector<1x128xi1> to vector<16x128xi1>
    %70 = arith.select %69, %64, %67 : vector<16x128xi1>, vector<16x128xf32>
    %c127_i32_23 = arith.constant 127 : i32
    %71 = tpu.dynamic_rotate %64 by %c127_i32_23 dim 1 : vector<16x128xf32>, i32 -> vector<16x128xf32>
    %72 = vector.shape_cast %20 : vector<1x128xi1> to vector<1x128xi1>
    %73 = vector.broadcast %72 : vector<1x128xi1> to vector<16x128xi1>
    %74 = arith.select %73, %64, %71 : vector<16x128xi1>, vector<16x128xf32>
    %75 = tpu.concatenate %70, %64, %74 in 0 : vector<16x128xf32>, vector<16x128xf32>, vector<16x128xf32> -> vector<48x128xf32>
    %76 = arith.truncf %65 : vector<1x48xf32> to vector<1x48xbf16>
    %77 = arith.truncf %75 : vector<48x128xf32> to vector<48x128xbf16>
    %cst_24 = arith.constant dense<0.000000e+00> : vector<1x128xf32>
    %78 = tpu.matmul %76, %77, %cst_24 {dimension_numbers = #tpu.dot_dimension_numbers<[1], [0], [0], [1], [0, 0, 1, 1], [], []>} : vector<1x48xbf16>, vector<48x128xbf16>, vector<1x128xf32> -> vector<1x128xf32>
    %79 = vector.broadcast %66 : vector<1x1xf32> to vector<1x128xf32>
    %80 = arith.addf %78, %79 : vector<1x128xf32>
    %c0_25 = arith.constant 0 : index
    %c0_26 = arith.constant 0 : index
    %81 = vector.load %arg7[%c0_25, %c0_26] : memref<1x128xf32, #tpu.memory_space<vmem>>, vector<1x128xf32>
    tpu.vector_store %arg7[%c0_25, %c0_26], %80 {strides = array<i32>} : memref<1x128xf32, #tpu.memory_space<vmem>>, vector<1x128xf32>,
    return
  }
}

</mosaic_0001>

<bundles_post_ra>
// kernel: _lambda_.1
= control target key start
LH: loop header
LB: loop body
LE: loop exit
PB: predicated region body
PF: predicated region fallthrough
CT: control target
= control target key end

     0   :  { %s526_s0 = inlined_call_operand.vmem [shape: f32[1,128], index: 0, kind: input, shape index: {}]   ;;  %s527_s1 = inlined_call_operand.vmem [shape: f32[8,3], index: 1, kind: input, shape index: {}]   ;;  %s528_s2 = inlined_call_operand.hbm [shape: f32[8,1], index: 2, kind: input, shape index: {}]   ;;  %s529_s3 = inlined_call_operand.hbm [shape: f32[16,24], index: 3, kind: input, shape index: {}]   ;;  %s530_s4 = inlined_call_operand.hbm [shape: f32[16,1], index: 4, kind: input, shape index: {}]   ;;  %s531_s5 = inlined_call_operand.vmem [shape: f32[1,48], index: 5, kind: input, shape index: {}]   ;;  %s532_s6 = inlined_call_operand.<no memory space> [shape: f32[1,1], index: 6, kind: input, shape index: {}]   ;;  %s533_s7 = inlined_call_operand.vmem [shape: f32[1,128], index: 7, kind: output, shape index: {}]  }
   0x1   :  { %v12_v0 = vstv %s532_s6 }
   0x2   :  { %13 = vst [vmem:[#allocation2] sm:$0x1] %v12_v0 }
   0x3   :  { %14 = vsyncpa [#allocation4], 0 }
   0x4   :  { %15 = vsyncpa [#allocation6], 0  ;;  %s407_s26 = smov [#allocation5]  }
   0x5   :  { %s35_s27 = sshll.u32 %s407_s26, 4  ;;  %s36_s27 = int_to_ptr.vmem [resolvable:$true] %s35_s27 }
   0x6   :  { %s351_s28 = scalar_lea.vmem %s36_s27, 256  ;;  %p356_p1 = scmp.lt.s32.totalorder %s36_s27, %s36_s27 }
   0x7   :  { %p352_p0 = scmp.ne.s32.totalorder %s36_s27, %s351_s28  ;;  %p357_p2 = scmp.lt.s32.totalorder %s351_s28, %s351_s28 }
   0x9   :  { %p358_p3 = por %p357_p2, %p356_p1 }
   0xb   :  { %p359_p4 = pnand %p358_p3, %p352_p0 }
   0xd   :  { %362 = shalt.err (!%p359_p4)
}
   0xe   :  { %s408_s29 = smov 128   ;;  %s409_s30 = smov 8  }
   0xf   :  { %41 = dma.hbm_to_vmem [thread:$0]  %s529_s3, 256, %s36_s27, [#allocation6], %s408_s29, %s408_s29, %s409_s30  }
  0x10   :  { %s410_s6 = smov [#allocation3]   ;;  %s411_s11 = smov [#allocation7]  }
  0x11   :  { %s26_s10 = sshll.u32 %s410_s6, 4  ;;  %s47_s12 = sshll.u32 %s411_s11, 4  ;;  %s27_s10 = int_to_ptr.vmem [resolvable:$true] %s26_s10  ;;  %s48_s12 = int_to_ptr.vmem [resolvable:$true] %s47_s12 }
  0x12   :  { %s371_s13 = scalar_lea.vmem %s27_s10, 128  ;;  %p376_p6 = scmp.lt.s32.totalorder %s27_s10, %s27_s10 }
  0x13   :  { %p372_p5 = scmp.ne.s32.totalorder %s27_s10, %s371_s13  ;;  %p377_p7 = scmp.lt.s32.totalorder %s371_s13, %s371_s13 }
  0x15   :  { %p378_p8 = por %p377_p7, %p376_p6 }
  0x17   :  { %p379_p9 = pnand %p378_p8, %p372_p5 }
  0x19   :  { %382 = shalt.err (!%p379_p9)
}
  0x1a   :  { %29 = dma.hbm_to_vmem [thread:$0]  %s528_s2, 128, %s27_s10, [#allocation4]  }
  0x1b   :  { %s391_s16 = scalar_lea.vmem %s48_s12, 256  ;;  %p396_p11 = scmp.lt.s32.totalorder %s48_s12, %s48_s12 }
  0x1c   :  { %p392_p10 = scmp.ne.s32.totalorder %s48_s12, %s391_s16  ;;  %p397_p12 = scmp.lt.s32.totalorder %s391_s16, %s391_s16 }
  0x1e   :  { %p398_p13 = por %p397_p12, %p396_p11 }
  0x20   :  { %p399_p0 = pnand %p398_p13, %p392_p10 }
  0x22   :  { %402 = shalt.err (!%p399_p0)
}
  0x23   :  { %53 = dma.hbm_to_vmem [thread:$0]  %s530_s4, 256, %s48_s12, [#allocation6], %s408_s29, %s408_s29, %s409_s30  }
  0x24   :  { %403 = dma.done.wait [#allocation4], 128  }
  0x25   :  { %404 = vsyncadd [#allocation4], 4294967168 }
  0x26   :  { %405 = dma.done.wait [#allocation6], 512  }
  0x27   :  { %406 = vsyncadd [#allocation6], 4294966784  ;;  %v412_v1 = vmov 0   ;;  %v86_v2 = vld [vmem:[#allocation3] sm:$0xff]  ;;  %v85_v3 = vld [vmem:[%s527_s1] sm:$0xff]  ;;  %v413_v5 = vmov 1   ;;  %v68_v7 = vlaneseq }
  0x28   :  { %328 = vset.pattern.permute.xlu1 %v412_v1  ;;  %327 = vset.pattern.permute.xlu0 %v412_v1  ;;  %v84_v4 = vld [vmem:[%s526_s0] sm:$0x1]  ;;  %s414_s4 = smov 1   ;;  %v415_v6 = vmov 2   ;;  %s416_s21 = smov 127   ;;  %v417_v22 = vmov 0.0  }
  0x29   :  { %95 = vperm.xlu1 %328, %v86_v2   ;;  %100 = vperm.xlu0 %327, %v85_v3   ;;  %v69_v8 = vand.u32 127, %v68_v7  ;;  %v104_v10 = vshrl.u32 %v68_v7, 7  ;;  %vm418_vm2 = vmmov 0   ;;  %v135_v33 = vld [vmem:[#allocation7 + $0x8] sm:$0xff]  ;;  %v134_v34 = vld [vmem:[#allocation7] sm:$0xff]  ;;  %vm163_vm3 = vcmask 1043456  }
  0x2a   :  { %297 = vmatprep.subr.bf16.mxu0 %v417_v22  ;;  %305 = vmatprep.subr.bf16.mxu1 %v417_v22  ;;  %v211_v35 = vld [vmem:[#allocation2] sm:$0x1]  ;;  %v132_v42 = vld [vmem:[#allocation5] sm:$0xff]  ;;  %v133_v43 = vld [vmem:[#allocation5 + $0x8] sm:$0xff]  ;;  %vm159_vm4 = vcmask 195584   ;;  %vm237_vm5 = vcmask 392192  }
  0x2b   :  { %v74_v9 = vand.u32 31, %v69_v8  ;;  %v483_v14 = vsub.s32 0, %v104_v10  ;;  %301 = vmatprep.mubr.msk.bf16.mxu0 %vm418_vm2, %v417_v22  ;;  %311 = vmatprep.mubr.msk.bf16.mxu1 %vm418_vm2, %v417_v22  ;;  %v146_v45 = vpack.c.bf16 %v133_v43, %v132_v42 }
  0x2d   :  { %329 = vset.pattern.permute.xlu1 %v413_v5  ;;  %87 = vrot.lane.b32.xlu0 %v84_v4, %s414_s4  ;;  %vm479_vm0 = vcmp.eq.s32.totalorder %v74_v9, 0  ;;  %v117_v19 = vrot.slane %v84_v4, %v483_v14  ;;  %vm489_vm1 = vcmp.eq.s32.totalorder %v74_v9, 31  ;;  %v210_v5 = vld [vmem:[%s531_s5] sm:$0x1] }
  0x2e   :  { %110 = vperm.xlu1 %329, %v85_v3   ;;  %330 = vset.pattern.permute.xlu0 %v415_v6  ;;  %v224_v7 = vpack.c.bf16 %v210_v5, %v210_v5 }
  0x31   :  { %122 = vperm.xlu0 %330, %v85_v3  }
  0x32   :  { %90 = vrot.lane.b32.xlu1 %v84_v4, %s416_s21 }
  0x33   :  { %331 = vset.pattern.permute.xlu1 %v412_v1 }
  0x35   :  { %332 = vset.pattern.permute.xlu0 %v412_v1 }
  0xa4   :  { %v96_v11 = vpop.permute.xlu1 %95  ;;  %v101_v12 = vpop.permute.xlu0 %100 }
  0xa8   :  { %v88_v15 = vpop.permute.xlu0 %87 }
  0xa9   :  { %v89_v16 = vsel %vm479_vm0, %v84_v4, %v88_v15  ;;  %v111_v17 = vpop.permute.xlu1 %110 }
  0xaa   :  { %v106_v18 = vrot.slane %v89_v16, %v483_v14  ;;  %v119_v25 = vmul.f32 %v117_v19, %v111_v17 }
  0xac   :  { %v107_v21 = vmul.f32 %v106_v18, %v101_v12  ;;  %v123_v27 = vpop.permute.xlu0 %122 }
  0xad   :  { %v91_v23 = vpop.permute.xlu1 %90 }
  0xae   :  { %v108_v24 = vadd.f32 %v107_v21, %v96_v11  ;;  %v92_v26 = vsel %vm489_vm1, %v84_v4, %v91_v23 }
  0xaf   :  { %v128_v28 = vrot.slane %v92_v26, %v483_v14 }
  0xb0   :  { %v120_v29 = vadd.f32 %v119_v25, %v108_v24 }
  0xb1   :  { %v129_v30 = vmul.f32 %v128_v28, %v123_v27 }
  0xb3   :  { %v130_v31 = vadd.f32 %v129_v30, %v120_v29 }
  0xb5   :  { %v131_v32 = vmax.f32 %v130_v31, 0.0 }
  0xb7   :  { %136 = vrot.lane.b32.xlu0 %v131_v32, %s414_s4  ;;  %141 = vrot.lane.b32.xlu1 %v131_v32, %s416_s21 }
  0xbb   :  { %156 = vperm.xlu0 %332, %v135_v33   ;;  %151 = vperm.xlu1 %331, %v134_v34  }
  0xbf   :  { %230 = vperm.xlu0 %332, %v211_v35  }
 0x129   :  { %v142_v36 = vpop.permute.xlu1 %141  ;;  %v137_v37 = vpop.permute.xlu0 %136 }
 0x12a   :  { %v145_v38 = vsel %vm489_vm1, %v131_v32, %v142_v36  ;;  %v140_v40 = vsel %vm479_vm0, %v131_v32, %v137_v37 }
 0x12b   :  { %v148_v39 = vpack.c.bf16 %v145_v38, %v145_v38  ;;  %v147_v44 = vpack.c.bf16 %v131_v32, %v140_v40 }
 0x12d   :  { %v165_v41 = vsel %vm163_vm3, %v148_v39, 0 }
 0x12e   :  { %298 = vmatpush3.bf16.msra.mxu0 %v165_v41 }
 0x12f   :  { %299 = vmatprep.subr.bf16.mxu0 %v417_v22 }
 0x132   :  { %300 = vmatpush3.bf16.msra.mxu0 %v147_v44 }
 0x135   :  { %302 = vmatmul.mubr.msk.bf16.vlgmr.msra.gmra.mxu0 %vm159_vm4, %v146_v45 }
 0x136   :  { %v152_v47 = vpop.permute.xlu1 %151  ;;  %v157_v50 = vpop.permute.xlu0 %156 }
 0x13a   :  { %v231_v8 = vpop.permute.xlu0 %230 }
 0x13b   :  { %v236_v9 = vrot.slane %v231_v8, %v483_v14 }
 0x1f5   :  { %v201_v46 = vpop.f32.mrf.mxu0 }
 0x1f6   :  { %v202_v49 = vadd.f32 %v201_v46, %v152_v47 }
 0x1f7   :  { %v303_v48 = vpop.f32.mrf.mxu0 }
 0x1f8   :  { %v208_v54 = vmax.f32 %v202_v49, 0.0 }
 0x1f9   :  { %v204_v51 = vpop.f32.mrf.mxu0 }
 0x1fa   :  { %v205_v52 = vadd.f32 %v204_v51, %v157_v50 }
 0x1fb   :  { %v304_v53 = vpop.f32.mrf.mxu0 }
 0x1fc   :  { %v209_v55 = vmax.f32 %v205_v52, 0.0 }
 0x1fe   :  { %v333_v56 = vpack.i.bf16 %v209_v55, %v208_v54  ;;  %v226_v2 = vpack.c.bf16 %v209_v55, %v208_v54 }
 0x200   :  { %334 = vrot.lane.b32.xlu1 %v333_v56, %s416_s21 }
 0x204   :  { %339 = vrot.lane.b32.xlu1 %v333_v56, %s414_s4 }
 0x272   :  { %v335_v57 = vpop.permute.xlu1 %334 }
 0x273   :  { %v337_v58 = vunpack.i.h.bf16 %v335_v57  ;;  %v336_v59 = vunpack.i.l.bf16 %v335_v57 }
 0x275   :  { %v222_v60 = vsel %vm489_vm1, %v208_v54, %v336_v59  ;;  %v223_v61 = vsel %vm489_vm1, %v209_v55, %v337_v58 }
 0x276   :  { %v340_v62 = vpop.permute.xlu1 %339  ;;  %v227_v63 = vpack.c.bf16 %v223_v61, %v222_v60 }
 0x277   :  { %v342_v0 = vunpack.i.h.bf16 %v340_v62  ;;  %v341_v1 = vunpack.i.l.bf16 %v340_v62 }
 0x278   :  { %306 = vmatpush3.bf16.msra.mxu1 %v227_v63 }
 0x279   :  { %307 = vmatprep.subr.bf16.mxu1 %v417_v22  ;;  %v216_v3 = vsel %vm479_vm0, %v208_v54, %v341_v1  ;;  %v217_v4 = vsel %vm479_vm0, %v209_v55, %v342_v0 }
 0x27a   :  { %v225_v6 = vpack.c.bf16 %v217_v4, %v216_v3 }
 0x27c   :  { %308 = vmatpush3.bf16.msra.mxu1 %v226_v2 }
 0x27d   :  { %309 = vmatprep.subr.bf16.mxu1 %v417_v22 }
 0x280   :  { %310 = vmatpush3.bf16.msra.mxu1 %v225_v6 }
 0x283   :  { %312 = vmatmul.mubr.msk.bf16.vlgmr.msra.gmra.mxu1 %vm237_vm5, %v224_v7 }
 0x343   :  { %v275_v10 = vpop.f32.mrf.mxu1 }
 0x344   :  { %v276_v11 = vadd.f32 %v275_v10, %v236_v9 }
 0x345   :  { %v313_v12 = vpop.f32.mrf.mxu1 }
 0x346   :  { %281 = vst [vmem:[%s533_s7] sm:$0x1] %v276_v11 }
 0x347   :  { %v278_v13 = vpop.f32.mrf.mxu1 }
 0x349   :  { %v314_v15 = vpop.f32.mrf.mxu1 }
 0x34a   :  { %286 = vsyncpa [#allocation4], 1 }
 0x34b   :  { %287 = vsyncpa [#allocation6], 1 }

</bundles_post_ra>
